<compile_context>
chip_gen: v5e
topology: v5e:2x2
jax: 0.10.0
libtpu: 0.0.40
codegen_flags: <defaults>
</compile_context>

<pallas_src>
import functools

import jax
import jax.numpy as jnp
from jax import lax
from jax.experimental import pallas as pl
from jax.experimental.pallas import tpu as pltpu


# ----------------------------------------------------------------------------
# Pallas kernel: LSTM recurrence over one time-chunk + (on the last chunk)
# the final linear layer.  Gate column order inside the kernel: (i, f, o, g).
# ----------------------------------------------------------------------------
def _rdqn_kernel(x_ref,      # (T_chunk*B_pad, D)  time-major rows, bf16
                 wih_ref,    # (D, 4H)             W_ih^T (gate-permuted), bf16
                 whh_ref,    # (H, 4H)             W_hh^T (gate-permuted), bf16
                 b_ref,      # (1, 4H)             b_ih + b_hh (permuted), f32
                 fcw_ref,    # (H, O_pad)          fc weight^T (zero-padded), bf16
                 fcb_ref,    # (1, O_pad)          fc bias (zero-padded), f32
                 out_ref,    # (B_pad, O_pad)      q-values, f32
                 h_scr,      # (B_pad, H) f32      hidden-state carry
                 c_scr,      # (B_pad, H) f32      cell-state carry
                 gx_scr,     # (T_chunk*B_pad, 4H) f32  hoisted input projection
                 *, hidden_dim, b_pad):
    H = hidden_dim
    t_chunk = x_ref.shape[0] // b_pad
    tc = pl.program_id(0)

    @pl.when(tc == 0)
    def _init():
        h_scr[...] = jnp.zeros_like(h_scr)
        c_scr[...] = jnp.zeros_like(c_scr)

    # Hoisted, chunk-wide input projection: one MXU matmul off the recurrence.
    gx_scr[...] = (
        jnp.dot(x_ref[...], wih_ref[...], preferred_element_type=jnp.float32)
        + b_ref[...])

    whh = whh_ref[...]  # (H, 4H) bf16, resident across all steps of the chunk

    def step(t, carry):
        h, c = carry                                         # f32 carries
        row = pl.multiple_of(t * b_pad, b_pad)               # sublane-aligned
        gates = gx_scr[pl.ds(row, b_pad), :] + jnp.dot(
            h.astype(whh.dtype), whh, preferred_element_type=jnp.float32)
        # Gate layout (i | f | o | g); H == 128 -> lane-aligned slices.
        sig = jax.nn.sigmoid(gates[:, 0:3 * H])              # one EUP slab
        i_g = sig[:, 0 * H:1 * H]
        f_g = sig[:, 1 * H:2 * H]
        o_g = sig[:, 2 * H:3 * H]
        g_g = jnp.tanh(gates[:, 3 * H:4 * H])
        c_new = f_g * c + i_g * g_g
        h_new = o_g * jnp.tanh(c_new)
        return h_new, c_new

    h_new, c_new = lax.fori_loop(0, t_chunk, step,
                                 (h_scr[...], c_scr[...]), unroll=True)
    h_scr[...] = h_new
    c_scr[...] = c_new

    @pl.when(tc == pl.num_programs(0) - 1)
    def _finalize():
        h_last = h_scr[...]
        out_ref[...] = (
            jnp.dot(h_last.astype(fcw_ref.dtype), fcw_ref[...],
                    preferred_element_type=jnp.float32)
            + fcb_ref[...])


# ----------------------------------------------------------------------------
# Wrapper
# ----------------------------------------------------------------------------
def _round_up(n, m):
    return ((n + m - 1) // m) * m


def _permute_gates_cols(w_t, H):
    """Permute columns of a (*, 4H) matrix from torch order (i,f,g,o) to the
    kernel order (i,f,o,g)."""
    i, f, g, o = (w_t[..., 0 * H:1 * H], w_t[..., 1 * H:2 * H],
                  w_t[..., 2 * H:3 * H], w_t[..., 3 * H:4 * H])
    return jnp.concatenate([i, f, o, g], axis=-1)


def rdqn_forward(seq, params, *, batch_size, sequence_length, input_dim,
                 hidden_dim, output_dim, time_chunk=None):
    """seq: [seq_length * batch_size, input_dim] flat sequence (as PyTorch's
    forward receives before `.view(batch, seq_len, input_dim)`).
    Returns q-values of shape [batch_size, output_dim]."""
    B, T, D, H, O = batch_size, sequence_length, input_dim, hidden_dim, output_dim
    b_pad = max(8, _round_up(B, 8))          # sublane tile
    o_pad = max(128, _round_up(O, 128))      # lane-dense output
    t_chunk = T if (time_chunk is None or T % time_chunk != 0) else time_chunk
    n_chunks = T // t_chunk

    # PyTorch: seq.view(batch, seq_len, input_dim) -> time-major -> pad batch.
    x = seq.reshape(B, T, D).astype(jnp.float32)
    x_tm = jnp.transpose(x, (1, 0, 2))                         # (T, B, D)
    x_tm = jnp.pad(x_tm, ((0, 0), (0, b_pad - B), (0, 0)))     # (T, B_pad, D)
    x_flat = x_tm.reshape(T * b_pad, D).astype(jnp.bfloat16)   # time-major rows

    # Weights: transpose, permute gate columns to (i,f,o,g), cast to bf16.
    wih_t = _permute_gates_cols(params["w_ih"].T, H).astype(jnp.bfloat16)
    whh_t = _permute_gates_cols(params["w_hh"].T, H).astype(jnp.bfloat16)
    b = _permute_gates_cols(
        (params["b_ih"] + params["b_hh"]).reshape(1, 4 * H), H
    ).astype(jnp.float32)
    fcw_t = jnp.zeros((H, o_pad), jnp.float32).at[:, :O].set(params["fc_w"].T)
    fcw_t = fcw_t.astype(jnp.bfloat16)                         # (H, O_pad)
    fcb = jnp.zeros((1, o_pad), jnp.float32).at[:, :O].set(params["fc_b"])

    kernel = functools.partial(_rdqn_kernel, hidden_dim=H, b_pad=b_pad)

    out = pl.pallas_call(
        kernel,
        out_shape=jax.ShapeDtypeStruct((b_pad, o_pad), jnp.float32),
        grid=(n_chunks,),
        in_specs=[
            pl.BlockSpec((t_chunk * b_pad, D), lambda i: (i, 0)),
            pl.BlockSpec((D, 4 * H), lambda i: (0, 0)),
            pl.BlockSpec((H, 4 * H), lambda i: (0, 0)),
            pl.BlockSpec((1, 4 * H), lambda i: (0, 0)),
            pl.BlockSpec((H, o_pad), lambda i: (0, 0)),
            pl.BlockSpec((1, o_pad), lambda i: (0, 0)),
        ],
        out_specs=pl.BlockSpec((b_pad, o_pad), lambda i: (0, 0)),
        scratch_shapes=[
            pltpu.VMEM((b_pad, H), jnp.float32),               # h carry
            pltpu.VMEM((b_pad, H), jnp.float32),               # c carry
            pltpu.VMEM((t_chunk * b_pad, 4 * H), jnp.float32), # hoisted x proj
        ],
        compiler_params=pltpu.CompilerParams(
            dimension_semantics=("arbitrary",),
            vmem_limit_bytes=32 * 1024 * 1024),
    )(x_flat, wih_t, whh_t, b, fcw_t, fcb)

    return out[:B, :O]


def init_params(key, input_dim, hidden_dim, output_dim):
    """Deterministic init mimicking torch.nn.LSTM / nn.Linear uniform(-k, k)."""
    ks = jax.random.split(key, 6)
    k_lstm = 1.0 / jnp.sqrt(hidden_dim)
    k_fc = 1.0 / jnp.sqrt(hidden_dim)
    u = lambda k, shape, bound: jax.random.uniform(
        k, shape, jnp.float32, minval=-bound, maxval=bound)
    return {
        "w_ih": u(ks[0], (4 * hidden_dim, input_dim), k_lstm),
        "w_hh": u(ks[1], (4 * hidden_dim, hidden_dim), k_lstm),
        "b_ih": u(ks[2], (4 * hidden_dim,), k_lstm),
        "b_hh": u(ks[3], (4 * hidden_dim,), k_lstm),
        "fc_w": u(ks[4], (output_dim, hidden_dim), k_fc),
        "fc_b": u(ks[5], (output_dim,), k_fc),
    }


# Pure-JAX reference with the same bf16 matmul-operand / f32 carry precision
# policy as the kernel (for a tight numerical check).  Uses the native torch
# gate order (i,f,g,o); the kernel's column permutation is semantics-preserving.
def rdqn_reference(seq, params, *, batch_size, sequence_length, input_dim,
                   hidden_dim, output_dim):
    B, T, D, H = batch_size, sequence_length, input_dim, hidden_dim
    x = seq.reshape(B, T, D).astype(jnp.float32)
    wih_t = params["w_ih"].T.astype(jnp.bfloat16)
    whh_t = params["w_hh"].T.astype(jnp.bfloat16)
    fcw_t = params["fc_w"].T.astype(jnp.bfloat16)
    b = (params["b_ih"] + params["b_hh"]).astype(jnp.float32)
    h = jnp.zeros((B, H), jnp.float32)
    c = jnp.zeros((B, H), jnp.float32)
    for t in range(T):
        x_t = x[:, t, :].astype(jnp.bfloat16)
        gates = (jnp.dot(x_t, wih_t, preferred_element_type=jnp.float32)
                 + jnp.dot(h.astype(jnp.bfloat16), whh_t,
                           preferred_element_type=jnp.float32)
                 + b)
        i_g = jax.nn.sigmoid(gates[:, 0 * H:1 * H])
        f_g = jax.nn.sigmoid(gates[:, 1 * H:2 * H])
        g_g = jnp.tanh(gates[:, 2 * H:3 * H])
        o_g = jax.nn.sigmoid(gates[:, 3 * H:4 * H])
        c = f_g * c + i_g * g_g
        h = o_g * jnp.tanh(c)
    return (jnp.dot(h.astype(jnp.bfloat16), fcw_t,
                    preferred_element_type=jnp.float32) + params["fc_b"])


if __name__ == "__main__":
    # Small shapes consistent with the module's forward:
    # input_dim=4 features, hidden_dim=128 (module default), output_dim=4
    # actions, batch=2, sequence_length=8.
    INPUT_DIM, HIDDEN_DIM, OUTPUT_DIM = 4, 128, 4
    BATCH, SEQ_LEN = 2, 8

    key = jax.random.PRNGKey(0)
    k_param, k_seq = jax.random.split(key)
    params = init_params(k_param, INPUT_DIM, HIDDEN_DIM, OUTPUT_DIM)

    # Flat sequence like the PyTorch forward receives ([batch*seq_len, features]).
    seq = jax.random.normal(k_seq, (BATCH * SEQ_LEN, INPUT_DIM), jnp.float32)

    qvals = rdqn_forward(seq, params, batch_size=BATCH,
                         sequence_length=SEQ_LEN, input_dim=INPUT_DIM,
                         hidden_dim=HIDDEN_DIM, output_dim=OUTPUT_DIM,
                         time_chunk=4)   # 2 time-chunks -> exercises the carry
    qvals = jax.block_until_ready(qvals)

    ref = rdqn_reference(seq, params, batch_size=BATCH,
                         sequence_length=SEQ_LEN, input_dim=INPUT_DIM,
                         hidden_dim=HIDDEN_DIM, output_dim=OUTPUT_DIM)

    assert qvals.shape == (BATCH, OUTPUT_DIM)
    assert jnp.allclose(qvals, ref, atol=2e-3, rtol=2e-3)

    print("KERNEL_OK")
</pallas_src>

<mosaic_0001>
module attributes {stable_mosaic.version = 11 : i64} {
  func.func @_rdqn_kernel(%arg0: i32, %arg1: memref<32x4xbf16, #tpu.memory_space<vmem>>, %arg2: memref<4x512xbf16, #tpu.memory_space<vmem>>, %arg3: memref<128x512xbf16, #tpu.memory_space<vmem>>, %arg4: memref<1x512xf32, #tpu.memory_space<vmem>>, %arg5: memref<128x128xbf16, #tpu.memory_space<vmem>>, %arg6: memref<1x128xf32, #tpu.memory_space<vmem>>, %arg7: memref<8x128xf32, #tpu.memory_space<vmem>>, %arg8: memref<8x128xf32, #tpu.memory_space<vmem>>, %arg9: memref<8x128xf32, #tpu.memory_space<vmem>>, %arg10: memref<32x512xf32, #tpu.memory_space<vmem>>) attributes {dimension_semantics = [#tpu.dimension_semantics<arbitrary>], iteration_bounds = array<i64: 2>, scalar_prefetch = 0 : i64, scratch_operands = 3 : i64, tpu.core_type = #tpu.core_type<tc>, window_params = [{transform_indices = @transform_0, window_bounds = array<i64: 32, 4>}, {pipeline_mode = #tpu.pipeline_mode<synchronous>, transform_indices = @transform_1, window_bounds = array<i64: 4, 512>}, {pipeline_mode = #tpu.pipeline_mode<synchronous>, transform_indices = @transform_2, window_bounds = array<i64: 128, 512>}, {pipeline_mode = #tpu.pipeline_mode<synchronous>, transform_indices = @transform_3, window_bounds = array<i64: 1, 512>}, {pipeline_mode = #tpu.pipeline_mode<synchronous>, transform_indices = @transform_4, window_bounds = array<i64: 128, 128>}, {pipeline_mode = #tpu.pipeline_mode<synchronous>, transform_indices = @transform_5, window_bounds = array<i64: 1, 128>}, {pipeline_mode = #tpu.pipeline_mode<synchronous>, transform_indices = @transform_6, window_bounds = array<i64: 8, 128>}]} {
    %c0_i32 = arith.constant 0 : i32
    %0 = arith.cmpi eq, %arg0, %c0_i32 : i32
    %1 = arith.extui %0 : i1 to i32
    %c0_i32_0 = arith.constant 0 : i32
    %2 = arith.cmpi ne, %1, %c0_i32_0 : i32
    scf.if %2 {
      %cst_36 = arith.constant 0.000000e+00 : f32
      %110 = vector.broadcast %cst_36 : f32 to vector<8x128xf32>
      %c0_37 = arith.constant 0 : index
      %c0_38 = arith.constant 0 : index
      %111 = vector.load %arg8[%c0_37, %c0_38] : memref<8x128xf32, #tpu.memory_space<vmem>>, vector<8x128xf32>
      tpu.vector_store %arg8[%c0_37, %c0_38], %110 {strides = array<i32>} : memref<8x128xf32, #tpu.memory_space<vmem>>, vector<8x128xf32>,
      %cst_39 = arith.constant 0.000000e+00 : f32
      %112 = vector.broadcast %cst_39 : f32 to vector<8x128xf32>
      %c0_40 = arith.constant 0 : index
      %c0_41 = arith.constant 0 : index
      %113 = vector.load %arg9[%c0_40, %c0_41] : memref<8x128xf32, #tpu.memory_space<vmem>>, vector<8x128xf32>
      tpu.vector_store %arg9[%c0_40, %c0_41], %112 {strides = array<i32>} : memref<8x128xf32, #tpu.memory_space<vmem>>, vector<8x128xf32>,
    } else {
    }
    %c0 = arith.constant 0 : index
    %c0_1 = arith.constant 0 : index
    %3 = vector.load %arg1[%c0, %c0_1] : memref<32x4xbf16, #tpu.memory_space<vmem>>, vector<32x4xbf16>
    %c0_2 = arith.constant 0 : index
    %c0_3 = arith.constant 0 : index
    %4 = vector.load %arg2[%c0_2, %c0_3] : memref<4x512xbf16, #tpu.memory_space<vmem>>, vector<4x512xbf16>
    %cst = arith.constant dense<0.000000e+00> : vector<32x512xf32>
    %5 = tpu.matmul %3, %4, %cst {dimension_numbers = #tpu.dot_dimension_numbers<[1], [0], [0], [1], [0, 0, 1, 1], [], []>} : vector<32x4xbf16>, vector<4x512xbf16>, vector<32x512xf32> -> vector<32x512xf32>
    %c0_4 = arith.constant 0 : index
    %c0_5 = arith.constant 0 : index
    %6 = vector.load %arg4[%c0_4, %c0_5] : memref<1x512xf32, #tpu.memory_space<vmem>>, vector<1x512xf32>
    %7 = vector.broadcast %6 : vector<1x512xf32> to vector<32x512xf32>
    %8 = arith.addf %5, %7 : vector<32x512xf32>
    %c0_6 = arith.constant 0 : index
    %c0_7 = arith.constant 0 : index
    %9 = vector.load %arg10[%c0_6, %c0_7] : memref<32x512xf32, #tpu.memory_space<vmem>>, vector<32x512xf32>
    tpu.vector_store %arg10[%c0_6, %c0_7], %8 {strides = array<i32>} : memref<32x512xf32, #tpu.memory_space<vmem>>, vector<32x512xf32>,
    %c0_8 = arith.constant 0 : index
    %c0_9 = arith.constant 0 : index
    %10 = vector.load %arg3[%c0_8, %c0_9] : memref<128x512xbf16, #tpu.memory_space<vmem>>, vector<128x512xbf16>
    %c0_10 = arith.constant 0 : index
    %c0_11 = arith.constant 0 : index
    %11 = vector.load %arg8[%c0_10, %c0_11] : memref<8x128xf32, #tpu.memory_space<vmem>>, vector<8x128xf32>
    %c0_12 = arith.constant 0 : index
    %c0_13 = arith.constant 0 : index
    %12 = vector.load %arg9[%c0_12, %c0_13] : memref<8x128xf32, #tpu.memory_space<vmem>>, vector<8x128xf32>
    %c0_i32_14 = arith.constant 0 : i32
    %c8_i32 = arith.constant 8 : i32
    %13 = arith.muli %c0_i32_14, %c8_i32 : i32
    %14 = tpu.assume_multiple %13, 8 : i32
    %15 = arith.index_cast %14 : i32 to index
    %c0_15 = arith.constant 0 : index
    %16 = vector.load %arg10[%15, %c0_15] : memref<32x512xf32, #tpu.memory_space<vmem>>, vector<8x512xf32>
    %17 = arith.truncf %11 : vector<8x128xf32> to vector<8x128xbf16>
    %cst_16 = arith.constant dense<0.000000e+00> : vector<8x512xf32>
    %18 = tpu.matmul %17, %10, %cst_16 {dimension_numbers = #tpu.dot_dimension_numbers<[1], [0], [0], [1], [0, 0, 1, 1], [], []>} : vector<8x128xbf16>, vector<128x512xbf16>, vector<8x512xf32> -> vector<8x512xf32>
    %19 = arith.addf %16, %18 : vector<8x512xf32>
    %20 = vector.extract_strided_slice %19 {offsets = [0, 0], sizes = [8, 384], strides = [1, 1]} : vector<8x512xf32> to vector<8x384xf32>
    %21 = arith.negf %20 : vector<8x384xf32>
    %22 = math.exp %21 : vector<8x384xf32>
    %cst_17 = arith.constant 1.000000e+00 : f32
    %23 = vector.broadcast %cst_17 : f32 to vector<8x384xf32>
    %24 = arith.addf %23, %22 : vector<8x384xf32>
    %25 = arith.divf %23, %24 : vector<8x384xf32>
    %26 = vector.extract_strided_slice %25 {offsets = [0, 0], sizes = [8, 128], strides = [1, 1]} : vector<8x384xf32> to vector<8x128xf32>
    %27 = vector.extract_strided_slice %25 {offsets = [0, 128], sizes = [8, 128], strides = [1, 1]} : vector<8x384xf32> to vector<8x128xf32>
    %28 = vector.extract_strided_slice %25 {offsets = [0, 256], sizes = [8, 128], strides = [1, 1]} : vector<8x384xf32> to vector<8x128xf32>
    %29 = vector.extract_strided_slice %19 {offsets = [0, 384], sizes = [8, 128], strides = [1, 1]} : vector<8x512xf32> to vector<8x128xf32>
    %30 = math.tanh %29 : vector<8x128xf32>
    %31 = arith.mulf %27, %12 : vector<8x128xf32>
    %32 = arith.mulf %26, %30 : vector<8x128xf32>
    %33 = arith.addf %31, %32 : vector<8x128xf32>
    %34 = math.tanh %33 : vector<8x128xf32>
    %35 = arith.mulf %28, %34 : vector<8x128xf32>
    %c1_i32 = arith.constant 1 : i32
    %c8_i32_18 = arith.constant 8 : i32
    %36 = arith.muli %c1_i32, %c8_i32_18 : i32
    %37 = tpu.assume_multiple %36, 8 : i32
    %38 = arith.index_cast %37 : i32 to index
    %c0_19 = arith.constant 0 : index
    %39 = vector.load %arg10[%38, %c0_19] : memref<32x512xf32, #tpu.memory_space<vmem>>, vector<8x512xf32>
    %40 = arith.truncf %35 : vector<8x128xf32> to vector<8x128xbf16>
    %cst_20 = arith.constant dense<0.000000e+00> : vector<8x512xf32>
    %41 = tpu.matmul %40, %10, %cst_20 {dimension_numbers = #tpu.dot_dimension_numbers<[1], [0], [0], [1], [0, 0, 1, 1], [], []>} : vector<8x128xbf16>, vector<128x512xbf16>, vector<8x512xf32> -> vector<8x512xf32>
    %42 = arith.addf %39, %41 : vector<8x512xf32>
    %43 = vector.extract_strided_slice %42 {offsets = [0, 0], sizes = [8, 384], strides = [1, 1]} : vector<8x512xf32> to vector<8x384xf32>
    %44 = arith.negf %43 : vector<8x384xf32>
    %45 = math.exp %44 : vector<8x384xf32>
    %cst_21 = arith.constant 1.000000e+00 : f32
    %46 = vector.broadcast %cst_21 : f32 to vector<8x384xf32>
    %47 = arith.addf %46, %45 : vector<8x384xf32>
    %48 = arith.divf %46, %47 : vector<8x384xf32>
    %49 = vector.extract_strided_slice %48 {offsets = [0, 0], sizes = [8, 128], strides = [1, 1]} : vector<8x384xf32> to vector<8x128xf32>
    %50 = vector.extract_strided_slice %48 {offsets = [0, 128], sizes = [8, 128], strides = [1, 1]} : vector<8x384xf32> to vector<8x128xf32>
    %51 = vector.extract_strided_slice %48 {offsets = [0, 256], sizes = [8, 128], strides = [1, 1]} : vector<8x384xf32> to vector<8x128xf32>
    %52 = vector.extract_strided_slice %42 {offsets = [0, 384], sizes = [8, 128], strides = [1, 1]} : vector<8x512xf32> to vector<8x128xf32>
    %53 = math.tanh %52 : vector<8x128xf32>
    %54 = arith.mulf %50, %33 : vector<8x128xf32>
    %55 = arith.mulf %49, %53 : vector<8x128xf32>
    %56 = arith.addf %54, %55 : vector<8x128xf32>
    %57 = math.tanh %56 : vector<8x128xf32>
    %58 = arith.mulf %51, %57 : vector<8x128xf32>
    %c2_i32 = arith.constant 2 : i32
    %c8_i32_22 = arith.constant 8 : i32
    %59 = arith.muli %c2_i32, %c8_i32_22 : i32
    %60 = tpu.assume_multiple %59, 8 : i32
    %61 = arith.index_cast %60 : i32 to index
    %c0_23 = arith.constant 0 : index
    %62 = vector.load %arg10[%61, %c0_23] : memref<32x512xf32, #tpu.memory_space<vmem>>, vector<8x512xf32>
    %63 = arith.truncf %58 : vector<8x128xf32> to vector<8x128xbf16>
    %cst_24 = arith.constant dense<0.000000e+00> : vector<8x512xf32>
    %64 = tpu.matmul %63, %10, %cst_24 {dimension_numbers = #tpu.dot_dimension_numbers<[1], [0], [0], [1], [0, 0, 1, 1], [], []>} : vector<8x128xbf16>, vector<128x512xbf16>, vector<8x512xf32> -> vector<8x512xf32>
    %65 = arith.addf %62, %64 : vector<8x512xf32>
    %66 = vector.extract_strided_slice %65 {offsets = [0, 0], sizes = [8, 384], strides = [1, 1]} : vector<8x512xf32> to vector<8x384xf32>
    %67 = arith.negf %66 : vector<8x384xf32>
    %68 = math.exp %67 : vector<8x384xf32>
    %cst_25 = arith.constant 1.000000e+00 : f32
    %69 = vector.broadcast %cst_25 : f32 to vector<8x384xf32>
    %70 = arith.addf %69, %68 : vector<8x384xf32>
    %71 = arith.divf %69, %70 : vector<8x384xf32>
    %72 = vector.extract_strided_slice %71 {offsets = [0, 0], sizes = [8, 128], strides = [1, 1]} : vector<8x384xf32> to vector<8x128xf32>
    %73 = vector.extract_strided_slice %71 {offsets = [0, 128], sizes = [8, 128], strides = [1, 1]} : vector<8x384xf32> to vector<8x128xf32>
    %74 = vector.extract_strided_slice %71 {offsets = [0, 256], sizes = [8, 128], strides = [1, 1]} : vector<8x384xf32> to vector<8x128xf32>
    %75 = vector.extract_strided_slice %65 {offsets = [0, 384], sizes = [8, 128], strides = [1, 1]} : vector<8x512xf32> to vector<8x128xf32>
    %76 = math.tanh %75 : vector<8x128xf32>
    %77 = arith.mulf %73, %56 : vector<8x128xf32>
    %78 = arith.mulf %72, %76 : vector<8x128xf32>
    %79 = arith.addf %77, %78 : vector<8x128xf32>
    %80 = math.tanh %79 : vector<8x128xf32>
    %81 = arith.mulf %74, %80 : vector<8x128xf32>
    %c3_i32 = arith.constant 3 : i32
    %c8_i32_26 = arith.constant 8 : i32
    %82 = arith.muli %c3_i32, %c8_i32_26 : i32
    %83 = tpu.assume_multiple %82, 8 : i32
    %84 = arith.index_cast %83 : i32 to index
    %c0_27 = arith.constant 0 : index
    %85 = vector.load %arg10[%84, %c0_27] : memref<32x512xf32, #tpu.memory_space<vmem>>, vector<8x512xf32>
    %86 = arith.truncf %81 : vector<8x128xf32> to vector<8x128xbf16>
    %cst_28 = arith.constant dense<0.000000e+00> : vector<8x512xf32>
    %87 = tpu.matmul %86, %10, %cst_28 {dimension_numbers = #tpu.dot_dimension_numbers<[1], [0], [0], [1], [0, 0, 1, 1], [], []>} : vector<8x128xbf16>, vector<128x512xbf16>, vector<8x512xf32> -> vector<8x512xf32>
    %88 = arith.addf %85, %87 : vector<8x512xf32>
    %89 = vector.extract_strided_slice %88 {offsets = [0, 0], sizes = [8, 384], strides = [1, 1]} : vector<8x512xf32> to vector<8x384xf32>
    %90 = arith.negf %89 : vector<8x384xf32>
    %91 = math.exp %90 : vector<8x384xf32>
    %cst_29 = arith.constant 1.000000e+00 : f32
    %92 = vector.broadcast %cst_29 : f32 to vector<8x384xf32>
    %93 = arith.addf %92, %91 : vector<8x384xf32>
    %94 = arith.divf %92, %93 : vector<8x384xf32>
    %95 = vector.extract_strided_slice %94 {offsets = [0, 0], sizes = [8, 128], strides = [1, 1]} : vector<8x384xf32> to vector<8x128xf32>
    %96 = vector.extract_strided_slice %94 {offsets = [0, 128], sizes = [8, 128], strides = [1, 1]} : vector<8x384xf32> to vector<8x128xf32>
    %97 = vector.extract_strided_slice %94 {offsets = [0, 256], sizes = [8, 128], strides = [1, 1]} : vector<8x384xf32> to vector<8x128xf32>
    %98 = vector.extract_strided_slice %88 {offsets = [0, 384], sizes = [8, 128], strides = [1, 1]} : vector<8x512xf32> to vector<8x128xf32>
    %99 = math.tanh %98 : vector<8x128xf32>
    %100 = arith.mulf %96, %79 : vector<8x128xf32>
    %101 = arith.mulf %95, %99 : vector<8x128xf32>
    %102 = arith.addf %100, %101 : vector<8x128xf32>
    %103 = math.tanh %102 : vector<8x128xf32>
    %104 = arith.mulf %97, %103 : vector<8x128xf32>
    %c4_i32 = arith.constant 4 : i32
    %c0_30 = arith.constant 0 : index
    %c0_31 = arith.constant 0 : index
    %105 = vector.load %arg8[%c0_30, %c0_31] : memref<8x128xf32, #tpu.memory_space<vmem>>, vector<8x128xf32>
    tpu.vector_store %arg8[%c0_30, %c0_31], %104 {strides = array<i32>} : memref<8x128xf32, #tpu.memory_space<vmem>>, vector<8x128xf32>,
    %c0_32 = arith.constant 0 : index
    %c0_33 = arith.constant 0 : index
    %106 = vector.load %arg9[%c0_32, %c0_33] : memref<8x128xf32, #tpu.memory_space<vmem>>, vector<8x128xf32>
    tpu.vector_store %arg9[%c0_32, %c0_33], %102 {strides = array<i32>} : memref<8x128xf32, #tpu.memory_space<vmem>>, vector<8x128xf32>,
    %c1_i32_34 = arith.constant 1 : i32
    %107 = arith.cmpi eq, %arg0, %c1_i32_34 : i32
    %108 = arith.extui %107 : i1 to i32
    %c0_i32_35 = arith.constant 0 : i32
    %109 = arith.cmpi ne, %108, %c0_i32_35 : i32
    scf.if %109 {
      %c0_36 = arith.constant 0 : index
      %c0_37 = arith.constant 0 : index
      %110 = vector.load %arg8[%c0_36, %c0_37] : memref<8x128xf32, #tpu.memory_space<vmem>>, vector<8x128xf32>
      %111 = arith.truncf %110 : vector<8x128xf32> to vector<8x128xbf16>
      %c0_38 = arith.constant 0 : index
      %c0_39 = arith.constant 0 : index
      %112 = vector.load %arg5[%c0_38, %c0_39] : memref<128x128xbf16, #tpu.memory_space<vmem>>, vector<128x128xbf16>
      %cst_40 = arith.constant dense<0.000000e+00> : vector<8x128xf32>
      %113 = tpu.matmul %111, %112, %cst_40 {dimension_numbers = #tpu.dot_dimension_numbers<[1], [0], [0], [1], [0, 0, 1, 1], [], []>} : vector<8x128xbf16>, vector<128x128xbf16>, vector<8x128xf32> -> vector<8x128xf32>
      %c0_41 = arith.constant 0 : index
      %c0_42 = arith.constant 0 : index
      %114 = vector.load %arg6[%c0_41, %c0_42] : memref<1x128xf32, #tpu.memory_space<vmem>>, vector<1x128xf32>
      %115 = vector.broadcast %114 : vector<1x128xf32> to vector<8x128xf32>
      %116 = arith.addf %113, %115 : vector<8x128xf32>
      %c0_43 = arith.constant 0 : index
      %c0_44 = arith.constant 0 : index
      %117 = vector.load %arg7[%c0_43, %c0_44] : memref<8x128xf32, #tpu.memory_space<vmem>>, vector<8x128xf32>
      tpu.vector_store %arg7[%c0_43, %c0_44], %116 {strides = array<i32>} : memref<8x128xf32, #tpu.memory_space<vmem>>, vector<8x128xf32>,
    } else {
    }
    return
  }
  func.func @transform_0(%arg0: i32) -> (i32, i32) {
    %c0_i32 = arith.constant 0 : i32
    %c0_i32_0 = arith.constant 0 : i32
    return %arg0, %c0_i32 : i32, i32
  }
  func.func @transform_1(%arg0: i32) -> (i32, i32) {
    %c0_i32 = arith.constant 0 : i32
    %c0_i32_0 = arith.constant 0 : i32
    %c0_i32_1 = arith.constant 0 : i32
    return %c0_i32, %c0_i32_0 : i32, i32
  }
  func.func @transform_2(%arg0: i32) -> (i32, i32) {
    %c0_i32 = arith.constant 0 : i32
    %c0_i32_0 = arith.constant 0 : i32
    %c0_i32_1 = arith.constant 0 : i32
    return %c0_i32, %c0_i32_0 : i32, i32
  }
  func.func @transform_3(%arg0: i32) -> (i32, i32) {
    %c0_i32 = arith.constant 0 : i32
    %c0_i32_0 = arith.constant 0 : i32
    %c0_i32_1 = arith.constant 0 : i32
    return %c0_i32, %c0_i32_0 : i32, i32
  }
  func.func @transform_4(%arg0: i32) -> (i32, i32) {
    %c0_i32 = arith.constant 0 : i32
    %c0_i32_0 = arith.constant 0 : i32
    %c0_i32_1 = arith.constant 0 : i32
    return %c0_i32, %c0_i32_0 : i32, i32
  }
  func.func @transform_5(%arg0: i32) -> (i32, i32) {
    %c0_i32 = arith.constant 0 : i32
    %c0_i32_0 = arith.constant 0 : i32
    %c0_i32_1 = arith.constant 0 : i32
    return %c0_i32, %c0_i32_0 : i32, i32
  }
  func.func @transform_6(%arg0: i32) -> (i32, i32) {
    %c0_i32 = arith.constant 0 : i32
    %c0_i32_0 = arith.constant 0 : i32
    %c0_i32_1 = arith.constant 0 : i32
    return %c0_i32, %c0_i32_0 : i32, i32
  }
}

</mosaic_0001>

<bundles_post_ra>
// kernel: tpu_custom_call.1
= control target key start
LH: loop header
LB: loop body
LE: loop exit
PB: predicated region body
PF: predicated region fallthrough
CT: control target
= control target key end

     0   :  { %11 = vsyncpa [#allocation6], 0  ;;  %s2103_s0 = inlined_call_operand.vmem [shape: bf16[64,4], index: 0, kind: input, shape index: {}]   ;;  %s2104_s1 = inlined_call_operand.vmem [shape: bf16[4,512], index: 1, kind: input, shape index: {}]   ;;  %s2105_s2 = inlined_call_operand.hbm [shape: bf16[128,512], index: 2, kind: input, shape index: {}]   ;;  %s2106_s3 = inlined_call_operand.vmem [shape: f32[1,512], index: 3, kind: input, shape index: {}]   ;;  %s2107_s4 = inlined_call_operand.hbm [shape: bf16[128,128], index: 4, kind: input, shape index: {}]   ;;  %s2108_s5 = inlined_call_operand.vmem [shape: f32[1,128], index: 5, kind: input, shape index: {}]   ;;  %s2109_s6 = inlined_call_operand.hbm [shape: f32[8,128], index: 6, kind: output, shape index: {}]  }
   0x1   :  { %12 = vsyncpa [#allocation9], 0 }
   0x2   :  { %13 = vsyncpa [#allocation7], 0  ;;  %s1788_s21 = smov 0  }
   0x3 LB: > { %s190_s24 = sshll.u32 %s2105_s2, 4  ;;  %s1797_s25 = sadd.s32 4294967295, %s1743_s21   ;;  %s1743_s21 = sphi %s1788_s21, %s19_s21   ;;  %s191_s24 = int_to_ptr.hbm [resolvable:$true] %s190_s24 }
   0x4   : > { %p1286_p0 = scmp.ge.s32.totalorder %s1743_s21, 1  ;;  %p176_p1 = scmp.lt.s32.totalorder %s1743_s21, 3 }
   0x5   : > { %p1287_p2 = scmp.ne.s32.totalorder %s1797_s25, 0  ;;  %p1550_p3 = scmp.eq.s32.totalorder %s1797_s25, 0 }
   0x6   : > { %p1803_p4 = pnand %p1286_p0, %p176_p1  ;;  %s1745_s27 = smov [#allocation5]  }
   0x7   : > { %s192_s28 = sshll.u32 %s1745_s27, 4  ;;  %s207_s7 = sshll.u32 %s2107_s4, 4  ;;  %s193_s28 = int_to_ptr.vmem [resolvable:$true] %s192_s28  ;;  %s208_s7 = int_to_ptr.hbm [resolvable:$true] %s207_s7 }
   0x8   : > { %p1543_p5 = pneg %p1803_p4  ;;  %s1746_s8 = smov [#allocation8]  }
   0x9   : > { %s209_s9 = sshll.u32 %s1746_s8, 4  ;;  %s1747_s10 = smov 256   ;;  %s210_s9 = int_to_ptr.vmem [resolvable:$true] %s209_s9 }
   0xa   : > { %p1544_p6 = pnand %p1550_p3, %p1543_p5  ;;  %s1748_s11 = smov 16  }
   0xb   : > { %s1749_s12 = smov 64   ;;  %s1750_s13 = smov 4  }
   0xc   : > { %1546 = dma.hbm_to_vmem [thread:$0]  (!%p1544_p6), %s191_s24, 4096, %s193_s28, [#allocation6], %s1747_s10, %s1747_s10, %s1748_s11  }
   0xd   : > { %1549 = dma.hbm_to_vmem [thread:$0]  (!%p1544_p6), %s208_s7, 1024, %s210_s9, [#allocation9], %s1749_s12, %s1749_s12, %s1750_s13  }
   0xe   : > { %237 = sbr.rel (%p1803_p4) target bundleno = 935 (0x3a7), region = 44 }
  0x13   : > { %1730 = dma.done.wait (%p1550_p3), [#allocation6], 4096  }
  0x14   : > { %1732 = vsyncadd (%p1550_p3), [#allocation6], 4294963200 }
  0x15   : > { %1734 = dma.done.wait (%p1550_p3), [#allocation9], 1024  }
  0x16   : > { %1736 = vsyncadd (%p1550_p3), [#allocation9], 4294966272  ;;  %s1293_s14 = sshll.u32 %s1797_s25, 2 }
  0x17   : > { %p269_p7 = scmp.lt.s32.totalorder %s1293_s14, 7  ;;  %278 = sbr.rel (%p1287_p2) target bundleno = 31 (0x1f), region = 56 }
  0x19   : > { %s2124_s14 = smov (!%p269_p7, %s1293_s14), 7 }
  0x1a   : > { %s1294_s15 = sshll.u32 %s2124_s14, 2 }
  0x1b   : > { %s1828_s18 = scalar_lea.vmem %s2103_s0, %s1294_s15 }
  0x1c   : > { %v1751_v0 = vmov 0.0  }
  0x1d   : > { %279 = vst [vmem:[#allocation2] sm:$0xff] %v1751_v0 }
  0x1e   : > { %280 = vst [vmem:[#allocation3] sm:$0xff] %v1751_v0 }
  0x1f PF: > { %v285_v1 = vld [vmem:[%s2104_s1] sm:$0xff]  ;;  %v1426_v2 = vld [vmem:[#allocation5 + $0xe0] sm:$0xf]  ;;  %v1521_v3 = vld [vmem:[#allocation5 + $0xec] sm:$0xf0]  ;;  %vm319_vm0 = vcmask 1041408  }
  0x20   : > { %307 = vst [vmem:[#allocation1] ss:$4 sm:$0xff] %v285_v1  ;;  %v1519_v4 = vld [vmem:[#allocation5 + $0xe4] sm:$0xf]  ;;  %v1428_v5 = vld [vmem:[#allocation5 + $0xf0] sm:$0xf0]  ;;  %v1835_v10 = vor.u32 %v1521_v3, %v1426_v2 }
  0x21   : > { %v1434_v6 = vld [vmem:[#allocation5 + $0xe8] sm:$0xf]  ;;  %v1522_v7 = vld [vmem:[#allocation5 + $0xf4] sm:$0xf0]  ;;  %v1520_v8 = vld [vmem:[#allocation5 + $0xec] sm:$0xf]  ;;  %v1837_v17 = vor.u32 %v1519_v4, %v1428_v5 }
  0x22   : > { %v1436_v9 = vld [vmem:[#allocation5 + $0xf8] sm:$0xf0]  ;;  %v1410_v11 = vld [vmem:[#allocation5 + $0xc0] sm:$0xf]  ;;  %v1517_v12 = vld [vmem:[#allocation5 + $0xcc] sm:$0xf0]  ;;  %v1847_v26 = vor.u32 %v1522_v7, %v1434_v6 }
  0x23   : > { %v1515_v13 = vld [vmem:[#allocation5 + $0xc4] sm:$0xf]  ;;  %v1412_v14 = vld [vmem:[#allocation5 + $0xd0] sm:$0xf0]  ;;  %v1489_v21 = vld [vmem:[%s1828_s18] sm:$0xff]  ;;  %vm312_vm1 = vcmask 31744   ;;  %v1843_v24 = vor.u32 %v1520_v8, %v1436_v9  ;;  %v1850_v29 = vor.u32 %v1517_v12, %v1410_v11 }
  0x24   : > { %v1516_v27 = vld [vmem:[#allocation5 + $0xcc] sm:$0xf]  ;;  %v1420_v28 = vld [vmem:[#allocation5 + $0xd8] sm:$0xf0]  ;;  %v1852_v30 = vor.u32 %v1515_v13, %v1412_v14  ;;  %v1418_v31 = vld [vmem:[#allocation5 + $0xc8] sm:$0xf] }
  0x25   : > { %v1518_v32 = vld [vmem:[#allocation5 + $0xd4] sm:$0xf0]  ;;  %v1394_v33 = vld [vmem:[#allocation5 + $0xa0] sm:$0xf]  ;;  %v1513_v34 = vld [vmem:[#allocation5 + $0xac] sm:$0xf0]  ;;  %v1858_v37 = vor.u32 %v1516_v27, %v1420_v28 }
  0x26   : > { %v1511_v35 = vld [vmem:[#allocation5 + $0xa4] sm:$0xf]  ;;  %v1396_v36 = vld [vmem:[#allocation5 + $0xb0] sm:$0xf0]  ;;  %v1862_v38 = vor.u32 %v1518_v32, %v1418_v31  ;;  %v1512_v39 = vld [vmem:[#allocation5 + $0xac] sm:$0xf]  ;;  %v1866_v41 = vor.u32 %v1513_v34, %v1394_v33 }
  0x27   : > { %v308_v15 = vld.sshfl [vmem:[#allocation1] sm:$0xff pattern:$0x73625140]  ;;  %v309_v16 = vld.sshfl [vmem:[#allocation1 + $0x8] sm:$0xff pattern:$0x73625140]  ;;  %v1868_v42 = vor.u32 %v1511_v35, %v1396_v36 }
  0x28   : > { %v320_v18 = vsel %vm319_vm0, %v308_v15, 0  ;;  %v322_v19 = vsel %vm319_vm0, %v309_v16, 0  ;;  %v310_v20 = vld.sshfl [vmem:[#allocation1 + $0x10] sm:$0xff pattern:$0x73625140]  ;;  %v1490_v63 = vld [vmem:[%s1828_s18 + $0x8] sm:$0xff] }
  0x29   : > { %335 = vmatpush.bf16.msra.mxu0 %v320_v18  ;;  %354 = vmatpush.bf16.msra.mxu1 %v322_v19  ;;  %v324_v22 = vsel %vm319_vm0, %v310_v20, 0  ;;  %v311_v23 = vld.sshfl [vmem:[#allocation1 + $0x18] sm:$0xff pattern:$0x73625140]  ;;  %v1404_v40 = vld [vmem:[#allocation5 + $0xb8] sm:$0xf0] }
  0x2a   : > { %373 = vmatpush.bf16.msra.mxu2 %v324_v22  ;;  %v326_v25 = vsel %vm319_vm0, %v311_v23, 0  ;;  %v1402_v43 = vld [vmem:[#allocation5 + $0xa8] sm:$0xf]  ;;  %v1514_v44 = vld [vmem:[#allocation5 + $0xb4] sm:$0xf0]  ;;  %v1871_v49 = vor.u32 %v1512_v39, %v1404_v40  ;;  %p1452_p8 = scmp.ne.s32.totalorder %s1797_s25, 1 }
  0x2b   : > { %392 = vmatpush.bf16.msra.mxu3 %v326_v25  ;;  %v1378_v45 = vld [vmem:[#allocation5 + $0x80] sm:$0xf]  ;;  %v1509_v46 = vld [vmem:[#allocation5 + $0x8c] sm:$0xf0]  ;;  %v1507_v47 = vld [vmem:[#allocation5 + $0x84] sm:$0xf]  ;;  %v1874_v50 = vor.u32 %v1514_v44, %v1402_v43 }
  0x2c   : > { %1304 = vmatmul.msk.bf16.vlgmr.msra.gmra.mxu0 %vm312_vm1, %v1489_v21  ;;  %1306 = vmatmul.msk.bf16.vlgmr.msra.gmra.mxu1 %vm312_vm1, %v1489_v21  ;;  %v1380_v48 = vld [vmem:[#allocation5 + $0x90] sm:$0xf0]  ;;  %v1508_v51 = vld [vmem:[#allocation5 + $0x8c] sm:$0xf]  ;;  %v1388_v52 = vld [vmem:[#allocation5 + $0x98] sm:$0xf0]  ;;  %v1878_v53 = vor.u32 %v1509_v46, %v1378_v45 }
  0x2d   : > { %622 = vmatpush.bf16.msrb.mxu0 %v1835_v10  ;;  %635 = vmatpush.bf16.msrb.mxu1 %v1837_v17  ;;  %v1880_v54 = vor.u32 %v1507_v47, %v1380_v48  ;;  %v1386_v55 = vld [vmem:[#allocation5 + $0x88] sm:$0xf]  ;;  %v1510_v56 = vld [vmem:[#allocation5 + $0x94] sm:$0xf0]  ;;  %v1362_v57 = vld [vmem:[#allocation5 + $0x60] sm:$0xf]  ;;  %v1883_v61 = vor.u32 %v1508_v51, %v1388_v52 }
  0x2e   : > { %1308 = vmatmul.msk.bf16.vlgmr.msra.gmra.mxu2 %vm312_vm1, %v1489_v21  ;;  %1310 = vmatmul.msk.bf16.vlgmr.msra.gmra.mxu3 %vm312_vm1, %v1489_v21  ;;  %v1505_v58 = vld [vmem:[#allocation5 + $0x6c] sm:$0xf0]  ;;  %v1503_v59 = vld [vmem:[#allocation5 + $0x64] sm:$0xf]  ;;  %v1364_v60 = vld [vmem:[#allocation5 + $0x70] sm:$0xf0]  ;;  %v1886_v62 = vor.u32 %v1510_v56, %v1386_v55 }
  0x2f   : > { %661 = vmatpush.bf16.msrb.mxu3 %v1843_v24  ;;  %648 = vmatpush.bf16.msrb.mxu2 %v1847_v26  ;;  %v1504_v0 = vld [vmem:[#allocation5 + $0x6c] sm:$0xf]  ;;  %v1372_v1 = vld [vmem:[#allocation5 + $0x78] sm:$0xf0]  ;;  %v1891_v2 = vor.u32 %v1505_v58, %v1362_v57  ;;  %v1893_v3 = vor.u32 %v1503_v59, %v1364_v60  ;;  %v1370_v4 = vld [vmem:[#allocation5 + $0x68] sm:$0xf] }
  0x30   : > { %v1506_v5 = vld [vmem:[#allocation5 + $0x74] sm:$0xf0]  ;;  %v1346_v6 = vld [vmem:[#allocation5 + $0x40] sm:$0xf]  ;;  %v1501_v7 = vld [vmem:[#allocation5 + $0x4c] sm:$0xf0]  ;;  %v1896_v11 = vor.u32 %v1504_v0, %v1372_v1 }
  0x31   : > { %623 = vmatpush.bf16.msrb.mxu0 %v1850_v29  ;;  %636 = vmatpush.bf16.msrb.mxu1 %v1852_v30  ;;  %v1499_v8 = vld [vmem:[#allocation5 + $0x44] sm:$0xf]  ;;  %v1348_v9 = vld [vmem:[#allocation5 + $0x50] sm:$0xf0]  ;;  %v1899_v12 = vor.u32 %v1506_v5, %v1370_v4  ;;  %v1500_v13 = vld [vmem:[#allocation5 + $0x4c] sm:$0xf]  ;;  %v1903_v15 = vor.u32 %v1501_v7, %v1346_v6 }
  0x32   : > { %v1356_v14 = vld [vmem:[#allocation5 + $0x58] sm:$0xf0]  ;;  %v1905_v16 = vor.u32 %v1499_v8, %v1348_v9  ;;  %v1354_v18 = vld [vmem:[#allocation5 + $0x48] sm:$0xf]  ;;  %v1502_v19 = vld [vmem:[#allocation5 + $0x54] sm:$0xf0] }
  0x33   : > { %662 = vmatpush.bf16.msrb.mxu3 %v1858_v37  ;;  %649 = vmatpush.bf16.msrb.mxu2 %v1862_v38  ;;  %v1330_v20 = vld [vmem:[#allocation5 + $0x20] sm:$0xf]  ;;  %v1497_v21 = vld [vmem:[#allocation5 + $0x2c] sm:$0xf0]  ;;  %v1495_v22 = vld [vmem:[#allocation5 + $0x24] sm:$0xf]  ;;  %v1911_v25 = vor.u32 %v1500_v13, %v1356_v14  ;;  %v1915_v27 = vor.u32 %v1502_v19, %v1354_v18 }
  0x34   : > { %v1332_v23 = vld [vmem:[#allocation5 + $0x30] sm:$0xf0]  ;;  %v1496_v28 = vld [vmem:[#allocation5 + $0x2c] sm:$0xf]  ;;  %v1340_v31 = vld [vmem:[#allocation5 + $0x38] sm:$0xf0]  ;;  %v1919_v32 = vor.u32 %v1497_v21, %v1330_v20 }
  0x35   : > { %624 = vmatpush.bf16.msrb.mxu0 %v1866_v41  ;;  %637 = vmatpush.bf16.msrb.mxu1 %v1868_v42  ;;  %v1921_v33 = vor.u32 %v1495_v22, %v1332_v23  ;;  %v1338_v34 = vld [vmem:[#allocation5 + $0x28] sm:$0xf]  ;;  %v1498_v35 = vld [vmem:[#allocation5 + $0x34] sm:$0xf0]  ;;  %v1314_v36 = vld [vmem:[#allocation5] sm:$0xf]  ;;  %v1924_v44 = vor.u32 %v1496_v28, %v1340_v31 }
  0x36   : > { %v1493_v39 = vld [vmem:[#allocation5 + $0xc] sm:$0xf0]  ;;  %v1491_v40 = vld [vmem:[#allocation5 + $0x4] sm:$0xf]  ;;  %v1316_v43 = vld [vmem:[#allocation5 + $0x10] sm:$0xf0]  ;;  %v1927_v45 = vor.u32 %v1498_v35, %v1338_v34 }
  0x37   : > { %663 = vmatpush.bf16.msrb.mxu3 %v1871_v49  ;;  %650 = vmatpush.bf16.msrb.mxu2 %v1874_v50  ;;  %v1492_v46 = vld [vmem:[#allocation5 + $0xc] sm:$0xf]  ;;  %v1324_v47 = vld [vmem:[#allocation5 + $0x18] sm:$0xf0]  ;;  %v1931_v48 = vor.u32 %v1493_v39, %v1314_v36  ;;  %v1933_v51 = vor.u32 %v1491_v40, %v1316_v43  ;;  %v1322_v52 = vld [vmem:[#allocation5 + $0x8] sm:$0xf] }
  0x38   : > { %v1494_v55 = vld [vmem:[#allocation5 + $0x14] sm:$0xf0]  ;;  %v1936_v56 = vor.u32 %v1492_v46, %v1324_v47  ;;  %v452_v57 = vld [vmem:[#allocation2] sm:$0xff]  ;;  %v286_v0 = vld [vmem:[%s2106_s3] sm:$0xf] }
  0x39   : > { %625 = vmatpush.bf16.msrb.mxu0 %v1878_v53  ;;  %638 = vmatpush.bf16.msrb.mxu1 %v1880_v54  ;;  %v1939_v58 = vor.u32 %v1494_v55, %v1322_v52  ;;  %v461_v59 = vpack.c.bf16 %v452_v57, %v452_v57  ;;  %v288_v1 = vperm.slane %v286_v0, 0  ;;  %v289_v5 = vperm.slane %v286_v0, 1 }
  0x3a   : > { %v291_v14 = vperm.slane %v286_v0, 3  ;;  %v290_v18 = vperm.slane %v286_v0, 2 }
  0x3b   : > { %664 = vmatpush.bf16.msrb.mxu3 %v1883_v61  ;;  %651 = vmatpush.bf16.msrb.mxu2 %v1886_v62 }
  0x3c   : > { %1305 = vmatmul.msk.bf16.gmra.mxu0 %vm312_vm1, %v1490_v63  ;;  %1307 = vmatmul.msk.bf16.gmra.mxu1 %vm312_vm1, %v1490_v63 }
  0x3d   : > { %626 = vmatpush.bf16.msrb.mxu0 %v1891_v2  ;;  %639 = vmatpush.bf16.msrb.mxu1 %v1893_v3 }
  0x3e   : > { %1309 = vmatmul.msk.bf16.gmra.mxu2 %vm312_vm1, %v1490_v63  ;;  %1311 = vmatmul.msk.bf16.gmra.mxu3 %vm312_vm1, %v1490_v63 }
  0x3f   : > { %665 = vmatpush.bf16.msrb.mxu3 %v1896_v11  ;;  %652 = vmatpush.bf16.msrb.mxu2 %v1899_v12 }
  0x41   : > { %627 = vmatpush.bf16.msrb.mxu0 %v1903_v15  ;;  %640 = vmatpush.bf16.msrb.mxu1 %v1905_v16 }
  0x43   : > { %666 = vmatpush.bf16.msrb.mxu3 %v1911_v25  ;;  %653 = vmatpush.bf16.msrb.mxu2 %v1915_v27 }
  0x45   : > { %628 = vmatpush.bf16.msrb.mxu0 %v1919_v32  ;;  %641 = vmatpush.bf16.msrb.mxu1 %v1921_v33 }
  0x47   : > { %667 = vmatpush.bf16.msrb.mxu3 %v1924_v44  ;;  %654 = vmatpush.bf16.msrb.mxu2 %v1927_v45 }
  0x49   : > { %629 = vmatpush.bf16.msrb.mxu0 %v1931_v48  ;;  %642 = vmatpush.bf16.msrb.mxu1 %v1933_v51 }
  0x4b   : > { %668 = vmatpush.bf16.msrb.mxu3 %v1936_v56  ;;  %655 = vmatpush.bf16.msrb.mxu2 %v1939_v58 }
  0x4c   : > { %630 = vmatmul.bf16.vlgmr.msrb.gmra.mxu0 %v461_v59  ;;  %643 = vmatmul.bf16.vlgmr.msrb.gmra.mxu1 %v461_v59 }
  0x4d   : > { %749 = vmatpush.bf16.msra.mxu0 %v1835_v10  ;;  %762 = vmatpush.bf16.msra.mxu1 %v1837_v17 }
  0x4e   : > { %656 = vmatmul.bf16.vlgmr.msrb.gmra.mxu2 %v461_v59  ;;  %669 = vmatmul.bf16.vlgmr.msrb.gmra.mxu3 %v461_v59 }
  0x4f   : > { %788 = vmatpush.bf16.msra.mxu3 %v1843_v24  ;;  %775 = vmatpush.bf16.msra.mxu2 %v1847_v26 }
  0x51   : > { %750 = vmatpush.bf16.msra.mxu0 %v1850_v29  ;;  %763 = vmatpush.bf16.msra.mxu1 %v1852_v30 }
  0x53   : > { %776 = vmatpush.bf16.msra.mxu2 %v1862_v38  ;;  %789 = vmatpush.bf16.msra.mxu3 %v1858_v37 }
  0x55   : > { %751 = vmatpush.bf16.msra.mxu0 %v1866_v41  ;;  %764 = vmatpush.bf16.msra.mxu1 %v1868_v42 }
  0x57   : > { %777 = vmatpush.bf16.msra.mxu2 %v1874_v50  ;;  %790 = vmatpush.bf16.msra.mxu3 %v1871_v49 }
  0x59   : > { %752 = vmatpush.bf16.msra.mxu0 %v1878_v53  ;;  %765 = vmatpush.bf16.msra.mxu1 %v1880_v54 }
  0x5b   : > { %778 = vmatpush.bf16.msra.mxu2 %v1886_v62  ;;  %791 = vmatpush.bf16.msra.mxu3 %v1883_v61 }
  0x5d   : > { %753 = vmatpush.bf16.msra.mxu0 %v1891_v2  ;;  %766 = vmatpush.bf16.msra.mxu1 %v1893_v3 }
  0x5f   : > { %779 = vmatpush.bf16.msra.mxu2 %v1899_v12  ;;  %792 = vmatpush.bf16.msra.mxu3 %v1896_v11 }
  0x61   : > { %754 = vmatpush.bf16.msra.mxu0 %v1903_v15  ;;  %767 = vmatpush.bf16.msra.mxu1 %v1905_v16 }
  0x63   : > { %780 = vmatpush.bf16.msra.mxu2 %v1915_v27  ;;  %793 = vmatpush.bf16.msra.mxu3 %v1911_v25 }
  0x65   : > { %755 = vmatpush.bf16.msra.mxu0 %v1919_v32  ;;  %768 = vmatpush.bf16.msra.mxu1 %v1921_v33 }
  0x67   : > { %781 = vmatpush.bf16.msra.mxu2 %v1927_v45  ;;  %794 = vmatpush.bf16.msra.mxu3 %v1924_v44 }
  0x69   : > { %756 = vmatpush.bf16.msra.mxu0 %v1931_v48  ;;  %769 = vmatpush.bf16.msra.mxu1 %v1933_v51 }
  0x6b   : > { %782 = vmatpush.bf16.msra.mxu2 %v1939_v58  ;;  %795 = vmatpush.bf16.msra.mxu3 %v1936_v56 }
  0x6d   : > { %876 = vmatpush.bf16.msrb.mxu0 %v1835_v10  ;;  %889 = vmatpush.bf16.msrb.mxu1 %v1837_v17 }
  0x6f   : > { %902 = vmatpush.bf16.msrb.mxu2 %v1847_v26  ;;  %915 = vmatpush.bf16.msrb.mxu3 %v1843_v24 }
  0x71   : > { %877 = vmatpush.bf16.msrb.mxu0 %v1850_v29  ;;  %890 = vmatpush.bf16.msrb.mxu1 %v1852_v30 }
  0x73   : > { %903 = vmatpush.bf16.msrb.mxu2 %v1862_v38  ;;  %916 = vmatpush.bf16.msrb.mxu3 %v1858_v37 }
  0x75   : > { %878 = vmatpush.bf16.msrb.mxu0 %v1866_v41  ;;  %891 = vmatpush.bf16.msrb.mxu1 %v1868_v42 }
  0x77   : > { %904 = vmatpush.bf16.msrb.mxu2 %v1874_v50  ;;  %917 = vmatpush.bf16.msrb.mxu3 %v1871_v49 }
  0x79   : > { %879 = vmatpush.bf16.msrb.mxu0 %v1878_v53  ;;  %892 = vmatpush.bf16.msrb.mxu1 %v1880_v54 }
  0x7b   : > { %905 = vmatpush.bf16.msrb.mxu2 %v1886_v62  ;;  %918 = vmatpush.bf16.msrb.mxu3 %v1883_v61 }
  0x7d   : > { %880 = vmatpush.bf16.msrb.mxu0 %v1891_v2  ;;  %893 = vmatpush.bf16.msrb.mxu1 %v1893_v3 }
  0x7f   : > { %906 = vmatpush.bf16.msrb.mxu2 %v1899_v12  ;;  %919 = vmatpush.bf16.msrb.mxu3 %v1896_v11 }
  0x81   : > { %881 = vmatpush.bf16.msrb.mxu0 %v1903_v15  ;;  %894 = vmatpush.bf16.msrb.mxu1 %v1905_v16 }
  0x83   : > { %907 = vmatpush.bf16.msrb.mxu2 %v1915_v27  ;;  %920 = vmatpush.bf16.msrb.mxu3 %v1911_v25 }
  0x85   : > { %882 = vmatpush.bf16.msrb.mxu0 %v1919_v32  ;;  %895 = vmatpush.bf16.msrb.mxu1 %v1921_v33 }
  0x87   : > { %908 = vmatpush.bf16.msrb.mxu2 %v1927_v45  ;;  %921 = vmatpush.bf16.msrb.mxu3 %v1924_v44 }
  0x89   : > { %883 = vmatpush.bf16.msrb.mxu0 %v1931_v48  ;;  %896 = vmatpush.bf16.msrb.mxu1 %v1933_v51 }
  0x8b   : > { %909 = vmatpush.bf16.msrb.mxu2 %v1939_v58  ;;  %922 = vmatpush.bf16.msrb.mxu3 %v1936_v56 }
  0xa9   : > { %v337_v60 = vpop.f32.mrf.mxu0  ;;  %v356_v63 = vpop.f32.mrf.mxu1 }
  0xaa   : > { %v338_v55 = vadd.f32 %v337_v60, %v288_v1  ;;  %v357_v59 = vadd.f32 %v356_v63, %v289_v5 }
  0xb1   : > { %v375_v4 = vpop.f32.mrf.mxu2  ;;  %v394_v6 = vpop.f32.mrf.mxu3 }
  0xb2   : > { %v339_v7 = vpop.f32.mrf.mxu0  ;;  %v358_v9 = vpop.f32.mrf.mxu1 }
  0xb3   : > { %v2012_v8 = vadd.f32 %v339_v7, %v288_v1  ;;  %v2014_v13 = vadd.f32 %v358_v9, %v289_v5 }
  0xb9   : > { %v377_v19 = vpop.f32.mrf.mxu2  ;;  %v396_v21 = vpop.f32.mrf.mxu3 }
  0xba   : > { %v2016_v20 = vadd.f32 %v377_v19, %v290_v18  ;;  %v342_v22 = vpop.f32.mrf.mxu0  ;;  %v2018_v23 = vadd.f32 %v396_v21, %v291_v14  ;;  %v361_v31 = vpop.f32.mrf.mxu1 }
  0xbb   : > { %v2020_v28 = vadd.f32 %v342_v22, %v288_v1  ;;  %v2022_v34 = vadd.f32 %v361_v31, %v289_v5 }
  0xc1   : > { %v380_v35 = vpop.f32.mrf.mxu2  ;;  %v399_v39 = vpop.f32.mrf.mxu3 }
  0xc2   : > { %v2024_v36 = vadd.f32 %v380_v35, %v290_v18  ;;  %v344_v40 = vpop.f32.mrf.mxu0  ;;  %v2026_v43 = vadd.f32 %v399_v39, %v291_v14  ;;  %v363_v47 = vpop.f32.mrf.mxu1 }
  0xc3   : > { %v2028_v46 = vadd.f32 %v344_v40, %v288_v1  ;;  %v2030_v52 = vadd.f32 %v363_v47, %v289_v5  ;;  %v376_v40 = vadd.f32 %v375_v4, %v290_v18 }
  0xc4   : > { %2111 = vst [vmem:[#allocation14_spill] sm:$0xff] %v2024_v36 }
  0xc5   : > { %2112 = vst [vmem:[#allocation15_spill] sm:$0xff] %v2026_v43 }
  0xc6   : > { %2113 = vst [vmem:[#allocation16_spill] sm:$0xff] %v2028_v46 }
  0xc7   : > { %2114 = vst [vmem:[#allocation17_spill] sm:$0xff] %v2030_v52 }
  0xc9   : > { %v382_v57 = vpop.f32.mrf.mxu2  ;;  %v401_v7 = vpop.f32.mrf.mxu3 }
  0xca   : > { %v2032_v0 = vadd.f32 %v382_v57, %v290_v18  ;;  %v631_v9 = vpop.f32.mrf.mxu0  ;;  %v2034_v19 = vadd.f32 %v401_v7, %v291_v14  ;;  %v644_v22 = vpop.f32.mrf.mxu1 }
  0xcb   : > { %v674_v21 = vadd.f32 %v631_v9, %v338_v55  ;;  %v675_v31 = vadd.f32 %v644_v22, %v357_v59 }
  0xcc   : > { %2115 = vst [vmem:[#allocation18_spill] sm:$0xff] %v2032_v0 }
  0xcd   : > { %2116 = vst [vmem:[#allocation19_spill] sm:$0xff] %v2034_v19  ;;  %v1440_v35 = vmul.f32 -1.442695, %v674_v21  ;;  %v1441_v39 = vmul.f32 -1.442695, %v675_v31  ;;  %v395_v21 = vadd.f32 %v394_v6, %v291_v14 }
  0xcf   : > { %1572 = vpow2.f32 %v1440_v35 }
  0xd0   : > { %1574 = vpow2.f32 %v1441_v39 }
  0xd1   : > { %v657_v46 = vpop.f32.mrf.mxu2  ;;  %v670_v52 = vpop.f32.mrf.mxu3 }
  0xd2   : > { %v676_v47 = vadd.f32 %v657_v46, %v376_v40  ;;  %v633_v60 = vpop.f32.mrf.mxu0  ;;  %v646_v1 = vpop.f32.mrf.mxu1  ;;  %v677_v18 = vadd.f32 %v670_v52, %v395_v21  ;;  %v453_v21 = vld [vmem:[#allocation3] sm:$0xff] }
  0xd4   : > { %v1442_v63 = vmul.f32 -1.442695, %v676_v47 }
  0xd5   : > { %v1573_v5 = vpop.eup %1572 }
  0xd6   : > { %v1575_v57 = vpop.eup %1574  ;;  %v687_v0 = vadd.f32 1.0, %v1573_v5  ;;  %1576 = vpow2.f32 %v1442_v63 }
  0xd7   : > { %v688_v7 = vadd.f32 1.0, %v1575_v57 }
  0xd8   : > { %1578 = vrcp.f32 %v687_v0  ;;  %v701_v47 = vand.u32 2147483648, %v687_v0  ;;  %v699_v63 = vand.u32 2147483647, %v687_v0  ;;  %vm695_vm4 = vweird.f32 %v687_v0 }
  0xd9   : > { %1580 = vrcp.f32 %v688_v7  ;;  %v659_v55 = vpop.f32.mrf.mxu2  ;;  %v672_v59 = vpop.f32.mrf.mxu3  ;;  %v716_v60 = vand.u32 2147483648, %v688_v7  ;;  %v714_v57 = vand.u32 2147483647, %v688_v7  ;;  %vm710_vm5 = vweird.f32 %v688_v7 }
  0xda   : > { %v702_v52 = vor.u32 1.1754944e-38, %v701_v47  ;;  %vm700_vm8 = vcmp.eq.f32.partialorder %v699_v63, 8.507059e+37 }
  0xdb   : > { %vm715_vm9 = vcmp.eq.f32.partialorder %v714_v57, 8.507059e+37 }
  0xdc   : > { %v1577_v9 = vpop.eup %1576 }
  0xdd   : > { %v689_v22 = vadd.f32 1.0, %v1577_v9  ;;  %v717_v9 = vor.u32 1.1754944e-38, %v716_v60 }
  0xde   : > { %v1579_v4 = vpop.eup %1578 }
  0xdf   : > { %v1581_v31 = vpop.eup %1580  ;;  %v691_v46 = vmul.f32 %v1579_v4, %v687_v0  ;;  %1582 = vrcp.f32 %v689_v22  ;;  %vm696_vm2 = vweird.f32 %v1579_v4  ;;  %v731_v47 = vand.u32 2147483648, %v689_v22 }
  0xe0   : > { %v706_v35 = vmul.f32 %v1581_v31, %v688_v7  ;;  %1584 = vtanh.f32 %v677_v18  ;;  %vm711_vm3 = vweird.f32 %v1581_v31  ;;  %vm697_vm6 = vmor %vm695_vm4, %vm696_vm2  ;;  %vm725_vm11 = vweird.f32 %v689_v22 }
  0xe1   : > { %v692_v39 = vsub.f32 1.0, %v691_v46  ;;  %vm712_vm7 = vmor %vm710_vm5, %vm711_vm3  ;;  %v729_v60 = vand.u32 2147483647, %v689_v22  ;;  %v732_v63 = vor.u32 1.1754944e-38, %v731_v47 }
  0xe2   : > { %v707_v40 = vsub.f32 1.0, %v706_v35 }
  0xe3   : > { %v693_v1 = vmul.f32 %v1579_v4, %v692_v39  ;;  %vm730_vm13 = vcmp.eq.f32.partialorder %v729_v60, 8.507059e+37 }
  0xe4   : > { %v708_v5 = vmul.f32 %v1581_v31, %v707_v40 }
  0xe5   : > { %v1583_v55 = vpop.eup %1582  ;;  %v694_v6 = vadd.f32 %v1579_v4, %v693_v1 }
  0xe6   : > { %v721_v14 = vmul.f32 %v1583_v55, %v689_v22  ;;  %v709_v59 = vadd.f32 %v1581_v31, %v708_v5  ;;  %v1585_v18 = vpop.eup %1584  ;;  %vm726_vm10 = vweird.f32 %v1583_v55 }
  0xe7   : > { %v698_v46 = vsel %vm697_vm6, %v1579_v4, %v694_v6  ;;  %vm727_vm12 = vmor %vm725_vm11, %vm726_vm10 }
  0xe8   : > { %v722_v35 = vsub.f32 1.0, %v721_v14  ;;  %v703_v39 = vsel %vm700_vm8, %v702_v52, %v698_v46  ;;  %v713_v19 = vsel %vm712_vm7, %v1581_v31, %v709_v59 }
  0xe9   : > { %v718_v40 = vsel %vm715_vm9, %v717_v9, %v713_v19  ;;  %v737_v43 = vmul.f32 %v1585_v18, %v703_v39 }
  0xea   : > { %v736_v36 = vmul.f32 %v718_v40, %v453_v21  ;;  %v723_v1 = vmul.f32 %v1583_v55, %v722_v35 }
  0xec   : > { %v2036_v0 = vadd.f32 %v737_v43, %v736_v36  ;;  %v724_v7 = vadd.f32 %v1583_v55, %v723_v1 }
  0xee   : > { %1586 = vtanh.f32 %v2036_v0  ;;  %v728_v4 = vsel %vm727_vm12, %v1583_v55, %v724_v7 }
  0xef   : > { %v733_v31 = vsel %vm730_vm13, %v732_v63, %v728_v4 }
  0xf4   : > { %v1587_v5 = vpop.eup %1586 }
  0xf5   : > { %v740_v57 = vmul.f32 %v1587_v5, %v733_v31 }
  0xf7   : > { %v748_v19 = vpack.c.bf16 %v740_v57, %v740_v57 }
  0xf9   : > { %757 = vmatmul.bf16.vlgmr.msra.gmra.mxu0 %v748_v19  ;;  %770 = vmatmul.bf16.vlgmr.msra.gmra.mxu1 %v748_v19 }
  0xfa   : > { %783 = vmatmul.bf16.vlgmr.msra.gmra.mxu2 %v748_v19  ;;  %796 = vmatmul.bf16.vlgmr.msra.gmra.mxu3 %v748_v19 }
  0xfb   : > { %1003 = vmatpush.bf16.msra.mxu0 %v1835_v10  ;;  %1016 = vmatpush.bf16.msra.mxu1 %v1837_v17 }
  0xfc   : > { %1029 = vmatpush.bf16.msra.mxu2 %v1847_v26  ;;  %1042 = vmatpush.bf16.msra.mxu3 %v1843_v24 }
  0xff   : > { %1004 = vmatpush.bf16.msra.mxu0 %v1850_v29  ;;  %1017 = vmatpush.bf16.msra.mxu1 %v1852_v30 }
 0x100   : > { %1030 = vmatpush.bf16.msra.mxu2 %v1862_v38  ;;  %1043 = vmatpush.bf16.msra.mxu3 %v1858_v37 }
 0x103   : > { %1005 = vmatpush.bf16.msra.mxu0 %v1866_v41  ;;  %1018 = vmatpush.bf16.msra.mxu1 %v1868_v42 }
 0x104   : > { %1031 = vmatpush.bf16.msra.mxu2 %v1874_v50  ;;  %1044 = vmatpush.bf16.msra.mxu3 %v1871_v49 }
 0x107   : > { %1006 = vmatpush.bf16.msra.mxu0 %v1878_v53  ;;  %1019 = vmatpush.bf16.msra.mxu1 %v1880_v54 }
 0x108   : > { %1032 = vmatpush.bf16.msra.mxu2 %v1886_v62  ;;  %1045 = vmatpush.bf16.msra.mxu3 %v1883_v61 }
 0x10b   : > { %1007 = vmatpush.bf16.msra.mxu0 %v1891_v2  ;;  %1020 = vmatpush.bf16.msra.mxu1 %v1893_v3 }
 0x10c   : > { %1033 = vmatpush.bf16.msra.mxu2 %v1899_v12  ;;  %1046 = vmatpush.bf16.msra.mxu3 %v1896_v11 }
 0x10f   : > { %1008 = vmatpush.bf16.msra.mxu0 %v1903_v15  ;;  %1021 = vmatpush.bf16.msra.mxu1 %v1905_v16 }
 0x110   : > { %1034 = vmatpush.bf16.msra.mxu2 %v1915_v27  ;;  %1047 = vmatpush.bf16.msra.mxu3 %v1911_v25 }
 0x113   : > { %1009 = vmatpush.bf16.msra.mxu0 %v1919_v32  ;;  %1022 = vmatpush.bf16.msra.mxu1 %v1921_v33 }
 0x114   : > { %1035 = vmatpush.bf16.msra.mxu2 %v1927_v45  ;;  %1048 = vmatpush.bf16.msra.mxu3 %v1924_v44 }
 0x117   : > { %1010 = vmatpush.bf16.msra.mxu0 %v1931_v48  ;;  %1023 = vmatpush.bf16.msra.mxu1 %v1933_v51 }
 0x118   : > { %1036 = vmatpush.bf16.msra.mxu2 %v1939_v58  ;;  %1049 = vmatpush.bf16.msra.mxu3 %v1936_v56 }
 0x176   : > { %v758_v10 = vpop.f32.mrf.mxu0  ;;  %v771_v17 = vpop.f32.mrf.mxu1 }
 0x177   : > { %v801_v24 = vadd.f32 %v758_v10, %v2012_v8  ;;  %v802_v26 = vadd.f32 %v771_v17, %v2014_v13 }
 0x179   : > { %v1443_v29 = vmul.f32 -1.442695, %v801_v24  ;;  %v1444_v30 = vmul.f32 -1.442695, %v802_v26 }
 0x17b   : > { %1588 = vpow2.f32 %v1443_v29  ;;  %v2117_v29 = vld [vmem:[#allocation14_spill] sm:$0xff] }
 0x17c   : > { %1590 = vpow2.f32 %v1444_v30 }
 0x17d   : > { %v784_v37 = vpop.f32.mrf.mxu2  ;;  %v797_v38 = vpop.f32.mrf.mxu3 }
 0x17e   : > { %v803_v41 = vadd.f32 %v784_v37, %v2016_v20  ;;  %v760_v42 = vpop.f32.mrf.mxu0  ;;  %v773_v49 = vpop.f32.mrf.mxu1  ;;  %v804_v16 = vadd.f32 %v797_v38, %v2018_v23 }
 0x180   : > { %v1445_v50 = vmul.f32 -1.442695, %v803_v41 }
 0x181   : > { %v1589_v53 = vpop.eup %1588 }
 0x182   : > { %v1591_v54 = vpop.eup %1590  ;;  %v814_v61 = vadd.f32 1.0, %v1589_v53  ;;  %1592 = vpow2.f32 %v1445_v50 }
 0x183   : > { %v815_v62 = vadd.f32 1.0, %v1591_v54 }
 0x184   : > { %1594 = vrcp.f32 %v814_v61  ;;  %v828_v45 = vand.u32 2147483648, %v814_v61  ;;  %v826_v56 = vand.u32 2147483647, %v814_v61  ;;  %vm822_vm0 = vweird.f32 %v814_v61 }
 0x185   : > { %1596 = vrcp.f32 %v815_v62  ;;  %v786_v2 = vpop.f32.mrf.mxu2  ;;  %v799_v3 = vpop.f32.mrf.mxu3  ;;  %v843_v48 = vand.u32 2147483648, %v815_v62  ;;  %v841_v8 = vand.u32 2147483647, %v815_v62  ;;  %vm837_vm1 = vweird.f32 %v815_v62 }
 0x186   : > { %v829_v36 = vor.u32 1.1754944e-38, %v828_v45  ;;  %vm827_vm4 = vcmp.eq.f32.partialorder %v826_v56, 8.507059e+37  ;;  %v2118_v2 = vld [vmem:[#allocation15_spill] sm:$0xff] }
 0x187   : > { %v844_v22 = vor.u32 1.1754944e-38, %v843_v48  ;;  %vm842_vm5 = vcmp.eq.f32.partialorder %v841_v8, 8.507059e+37 }
 0x188   : > { %v1593_v11 = vpop.eup %1592 }
 0x189   : > { %v816_v12 = vadd.f32 1.0, %v1593_v11 }
 0x18a   : > { %v1595_v15 = vpop.eup %1594 }
 0x18b   : > { %v1597_v25 = vpop.eup %1596  ;;  %v818_v27 = vmul.f32 %v1595_v15, %v814_v61  ;;  %1598 = vrcp.f32 %v816_v12  ;;  %vm823_vm14 = vweird.f32 %v1595_v15  ;;  %v858_v40 = vand.u32 2147483648, %v816_v12 }
 0x18c   : > { %v833_v32 = vmul.f32 %v1597_v25, %v815_v62  ;;  %1600 = vtanh.f32 %v804_v16  ;;  %vm838_vm15 = vweird.f32 %v1597_v25  ;;  %vm824_vm2 = vmor %vm822_vm0, %vm823_vm14  ;;  %vm852_vm7 = vweird.f32 %v816_v12 }
 0x18d   : > { %v819_v33 = vsub.f32 1.0, %v818_v27  ;;  %vm839_vm3 = vmor %vm837_vm1, %vm838_vm15  ;;  %v856_v1 = vand.u32 2147483647, %v816_v12  ;;  %v859_v47 = vor.u32 1.1754944e-38, %v858_v40 }
 0x18e   : > { %v834_v44 = vsub.f32 1.0, %v833_v32 }
 0x18f   : > { %v820_v51 = vmul.f32 %v1595_v15, %v819_v33  ;;  %vm857_vm9 = vcmp.eq.f32.partialorder %v856_v1, 8.507059e+37 }
 0x190   : > { %v835_v58 = vmul.f32 %v1597_v25, %v834_v44 }
 0x191   : > { %v1599_v13 = vpop.eup %1598  ;;  %v821_v20 = vadd.f32 %v1595_v15, %v820_v51 }
 0x192   : > { %v848_v23 = vmul.f32 %v1599_v13, %v816_v12  ;;  %v836_v43 = vadd.f32 %v1597_v25, %v835_v58  ;;  %v1601_v6 = vpop.eup %1600  ;;  %vm853_vm6 = vweird.f32 %v1599_v13 }
 0x193   : > { %v825_v55 = vsel %vm824_vm2, %v1595_v15, %v821_v20  ;;  %vm854_vm8 = vmor %vm852_vm7, %vm853_vm6 }
 0x194   : > { %v849_v14 = vsub.f32 1.0, %v848_v23  ;;  %v830_v52 = vsel %vm827_vm4, %v829_v36, %v825_v55  ;;  %v840_v59 = vsel %vm839_vm3, %v1597_v25, %v836_v43 }
 0x195   : > { %v845_v9 = vsel %vm842_vm5, %v844_v22, %v840_v59  ;;  %v864_v21 = vmul.f32 %v1601_v6, %v830_v52 }
 0x196   : > { %v863_v46 = vmul.f32 %v845_v9, %v2036_v0  ;;  %v850_v18 = vmul.f32 %v1599_v13, %v849_v14 }
 0x198   : > { %v2076_v35 = vadd.f32 %v864_v21, %v863_v46  ;;  %v851_v39 = vadd.f32 %v1599_v13, %v850_v18 }
 0x19a   : > { %1602 = vtanh.f32 %v2076_v35  ;;  %v855_v7 = vsel %vm854_vm8, %v1599_v13, %v851_v39 }
 0x19b   : > { %v860_v4 = vsel %vm857_vm9, %v859_v47, %v855_v7 }
 0x1a0   : > { %v1603_v60 = vpop.eup %1602 }
 0x1a1   : > { %v867_v63 = vmul.f32 %v1603_v60, %v860_v4 }
 0x1a3   : > { %v875_v5 = vpack.c.bf16 %v867_v63, %v867_v63  ;;  %v2119_v63 = vld [vmem:[#allocation16_spill] sm:$0xff] }
 0x1a5   : > { %884 = vmatmul.bf16.vlgmr.msrb.gmra.mxu0 %v875_v5  ;;  %897 = vmatmul.bf16.vlgmr.msrb.gmra.mxu1 %v875_v5 }
 0x1a6   : > { %910 = vmatmul.bf16.vlgmr.msrb.gmra.mxu2 %v875_v5  ;;  %923 = vmatmul.bf16.vlgmr.msrb.gmra.mxu3 %v875_v5 }
 0x222   : > { %v885_v0 = vpop.f32.mrf.mxu0  ;;  %v898_v31 = vpop.f32.mrf.mxu1 }
 0x223   : > { %v928_v57 = vadd.f32 %v885_v0, %v2020_v28  ;;  %v929_v19 = vadd.f32 %v898_v31, %v2022_v34  ;;  %v2120_v0 = vld [vmem:[#allocation17_spill] sm:$0xff] }
 0x225   : > { %v1446_v10 = vmul.f32 -1.442695, %v928_v57  ;;  %v1447_v17 = vmul.f32 -1.442695, %v929_v19 }
 0x227   : > { %1604 = vpow2.f32 %v1446_v10 }
 0x228   : > { %1606 = vpow2.f32 %v1447_v17 }
 0x229   : > { %v911_v24 = vpop.f32.mrf.mxu2  ;;  %v924_v26 = vpop.f32.mrf.mxu3 }
 0x22a   : > { %v930_v30 = vadd.f32 %v911_v24, %v2117_v29  ;;  %v887_v37 = vpop.f32.mrf.mxu0  ;;  %v900_v38 = vpop.f32.mrf.mxu1  ;;  %v931_v3 = vadd.f32 %v924_v26, %v2118_v2  ;;  %v2121_v24 = vld [vmem:[#allocation18_spill] sm:$0xff] }
 0x22c   : > { %v1448_v41 = vmul.f32 -1.442695, %v930_v30 }
 0x22d   : > { %v1605_v42 = vpop.eup %1604 }
 0x22e   : > { %v1607_v49 = vpop.eup %1606  ;;  %v941_v50 = vadd.f32 1.0, %v1605_v42  ;;  %1608 = vpow2.f32 %v1448_v41 }
 0x22f   : > { %v942_v53 = vadd.f32 1.0, %v1607_v49 }
 0x230   : > { %1610 = vrcp.f32 %v941_v50  ;;  %v955_v27 = vand.u32 2147483648, %v941_v50  ;;  %v953_v44 = vand.u32 2147483647, %v941_v50  ;;  %vm949_vm12 = vweird.f32 %v941_v50 }
 0x231   : > { %1612 = vrcp.f32 %v942_v53  ;;  %v913_v28 = vpop.f32.mrf.mxu2  ;;  %v926_v34 = vpop.f32.mrf.mxu3  ;;  %v970_v32 = vand.u32 2147483648, %v942_v53  ;;  %v968_v48 = vand.u32 2147483647, %v942_v53  ;;  %vm964_vm13 = vweird.f32 %v942_v53 }
 0x232   : > { %v956_v8 = vor.u32 1.1754944e-38, %v955_v27  ;;  %vm954_vm0 = vcmp.eq.f32.partialorder %v953_v44, 8.507059e+37 }
 0x233   : > { %v971_v20 = vor.u32 1.1754944e-38, %v970_v32  ;;  %vm969_vm1 = vcmp.eq.f32.partialorder %v968_v48, 8.507059e+37 }
 0x234   : > { %v1609_v54 = vpop.eup %1608 }
 0x235   : > { %v943_v61 = vadd.f32 1.0, %v1609_v54 }
 0x236   : > { %v1611_v62 = vpop.eup %1610 }
 0x237   : > { %v1613_v11 = vpop.eup %1612  ;;  %v945_v12 = vmul.f32 %v1611_v62, %v941_v50  ;;  %1614 = vrcp.f32 %v943_v61  ;;  %vm950_vm10 = vweird.f32 %v1611_v62  ;;  %v985_v46 = vand.u32 2147483648, %v943_v61 }
 0x238   : > { %v960_v15 = vmul.f32 %v1613_v11, %v942_v53  ;;  %1616 = vtanh.f32 %v931_v3  ;;  %vm965_vm11 = vweird.f32 %v1613_v11  ;;  %vm951_vm14 = vmor %vm949_vm12, %vm950_vm10  ;;  %vm979_vm3 = vweird.f32 %v943_v61 }
 0x239   : > { %v946_v16 = vsub.f32 1.0, %v945_v12  ;;  %vm966_vm15 = vmor %vm964_vm13, %vm965_vm11  ;;  %v983_v18 = vand.u32 2147483647, %v943_v61  ;;  %v986_v40 = vor.u32 1.1754944e-38, %v985_v46 }
 0x23a   : > { %v961_v25 = vsub.f32 1.0, %v960_v15 }
 0x23b   : > { %v947_v33 = vmul.f32 %v1611_v62, %v946_v16  ;;  %vm984_vm5 = vcmp.eq.f32.partialorder %v983_v18, 8.507059e+37 }
 0x23c   : > { %v962_v45 = vmul.f32 %v1613_v11, %v961_v25 }
 0x23d   : > { %v1615_v51 = vpop.eup %1614  ;;  %v948_v56 = vadd.f32 %v1611_v62, %v947_v33 }
 0x23e   : > { %v975_v58 = vmul.f32 %v1615_v51, %v943_v61  ;;  %v963_v13 = vadd.f32 %v1613_v11, %v962_v45  ;;  %v1617_v36 = vpop.eup %1616  ;;  %vm980_vm2 = vweird.f32 %v1615_v51  ;;  %v2122_v61 = vld [vmem:[#allocation19_spill] sm:$0xff] }
 0x23f   : > { %v952_v23 = vsel %vm951_vm14, %v1611_v62, %v948_v56  ;;  %vm981_vm4 = vmor %vm979_vm3, %vm980_vm2 }
 0x240   : > { %v976_v43 = vsub.f32 1.0, %v975_v58  ;;  %v957_v22 = vsel %vm954_vm0, %v956_v8, %v952_v23  ;;  %v967_v55 = vsel %vm966_vm15, %v1613_v11, %v963_v13 }
 0x241   : > { %v972_v6 = vsel %vm969_vm1, %v971_v20, %v967_v55  ;;  %v991_v14 = vmul.f32 %v1617_v36, %v957_v22 }
 0x242   : > { %v990_v52 = vmul.f32 %v972_v6, %v2076_v35  ;;  %v977_v59 = vmul.f32 %v1615_v51, %v976_v43 }
 0x244   : > { %v2084_v9 = vadd.f32 %v991_v14, %v990_v52  ;;  %v978_v21 = vadd.f32 %v1615_v51, %v977_v59 }
 0x246   : > { %1618 = vtanh.f32 %v2084_v9  ;;  %v982_v39 = vsel %vm981_vm4, %v1615_v51, %v978_v21 }
 0x247   : > { %v987_v7 = vsel %vm984_vm5, %v986_v40, %v982_v39 }
 0x24c   : > { %v1619_v1 = vpop.eup %1618 }
 0x24d   : > { %v994_v47 = vmul.f32 %v1619_v1, %v987_v7 }
 0x24f   : > { %v1002_v60 = vpack.c.bf16 %v994_v47, %v994_v47 }
 0x251   : > { %1011 = vmatmul.bf16.vlgmr.msra.gmra.mxu0 %v1002_v60  ;;  %1024 = vmatmul.bf16.vlgmr.msra.gmra.mxu1 %v1002_v60 }
 0x252   : > { %1037 = vmatmul.bf16.vlgmr.msra.gmra.mxu2 %v1002_v60  ;;  %1050 = vmatmul.bf16.vlgmr.msra.gmra.mxu3 %v1002_v60 }
 0x2ce   : > { %v1012_v35 = vpop.f32.mrf.mxu0  ;;  %v1025_v4 = vpop.f32.mrf.mxu1 }
 0x2cf   : > { %v1055_v5 = vadd.f32 %v1012_v35, %v2119_v63  ;;  %v1056_v31 = vadd.f32 %v1025_v4, %v2120_v0 }
 0x2d1   : > { %v1449_v57 = vmul.f32 -1.442695, %v1055_v5  ;;  %v1450_v19 = vmul.f32 -1.442695, %v1056_v31 }
 0x2d3   : > { %1620 = vpow2.f32 %v1449_v57 }
 0x2d4   : > { %1622 = vpow2.f32 %v1450_v19 }
 0x2d5   : > { %v1038_v10 = vpop.f32.mrf.mxu2  ;;  %v1051_v17 = vpop.f32.mrf.mxu3 }
 0x2d6   : > { %v1057_v26 = vadd.f32 %v1038_v10, %v2121_v24  ;;  %v1014_v29 = vpop.f32.mrf.mxu0  ;;  %v1027_v30 = vpop.f32.mrf.mxu1  ;;  %v1058_v62 = vadd.f32 %v1051_v17, %v2122_v61 }
 0x2d8   : > { %v1451_v37 = vmul.f32 -1.442695, %v1057_v26 }
 0x2d9   : > { %v1621_v38 = vpop.eup %1620 }
 0x2da   : > { %v1623_v41 = vpop.eup %1622  ;;  %v1068_v42 = vadd.f32 1.0, %v1621_v38  ;;  %1624 = vpow2.f32 %v1451_v37 }
 0x2db   : > { %v1069_v49 = vadd.f32 1.0, %v1623_v41 }
 0x2dc   : > { %1626 = vrcp.f32 %v1068_v42  ;;  %v1082_v16 = vand.u32 2147483648, %v1068_v42  ;;  %v1080_v32 = vand.u32 2147483647, %v1068_v42  ;;  %vm1076_vm8 = vweird.f32 %v1068_v42 }
 0x2dd   : > { %1628 = vrcp.f32 %v1069_v49  ;;  %v1040_v50 = vpop.f32.mrf.mxu2  ;;  %v1053_v53 = vpop.f32.mrf.mxu3  ;;  %v1097_v25 = vand.u32 2147483648, %v1069_v49  ;;  %v1095_v44 = vand.u32 2147483647, %v1069_v49  ;;  %vm1091_vm9 = vweird.f32 %v1069_v49 }
 0x2de   : > { %v1083_v56 = vor.u32 1.1754944e-38, %v1082_v16  ;;  %vm1081_vm12 = vcmp.eq.f32.partialorder %v1080_v32, 8.507059e+37 }
 0x2df   : > { %v1098_v8 = vor.u32 1.1754944e-38, %v1097_v25  ;;  %vm1096_vm13 = vcmp.eq.f32.partialorder %v1095_v44, 8.507059e+37 }
 0x2e0   : > { %v1625_v28 = vpop.eup %1624 }
 0x2e1   : > { %v1070_v34 = vadd.f32 1.0, %v1625_v28 }
 0x2e2   : > { %v1627_v54 = vpop.eup %1626 }
 0x2e3   : > { %v1629_v2 = vpop.eup %1628  ;;  %v1072_v3 = vmul.f32 %v1627_v54, %v1068_v42  ;;  %1630 = vrcp.f32 %v1070_v34  ;;  %vm1077_vm6 = vweird.f32 %v1627_v54  ;;  %v1112_v21 = vand.u32 2147483648, %v1070_v34 }
 0x2e4   : > { %v1087_v11 = vmul.f32 %v1629_v2, %v1069_v49  ;;  %1632 = vtanh.f32 %v1058_v62  ;;  %vm1092_vm7 = vweird.f32 %v1629_v2  ;;  %vm1078_vm10 = vmor %vm1076_vm8, %vm1077_vm6  ;;  %vm1106_vm15 = vweird.f32 %v1070_v34 }
 0x2e5   : > { %v1073_v12 = vsub.f32 1.0, %v1072_v3  ;;  %vm1093_vm11 = vmor %vm1091_vm9, %vm1092_vm7  ;;  %v1110_v46 = vand.u32 2147483647, %v1070_v34  ;;  %v1113_v39 = vor.u32 1.1754944e-38, %v1112_v21 }
 0x2e6   : > { %v1088_v15 = vsub.f32 1.0, %v1087_v11 }
 0x2e7   : > { %v1074_v27 = vmul.f32 %v1627_v54, %v1073_v12  ;;  %vm1111_vm1 = vcmp.eq.f32.partialorder %v1110_v46, 8.507059e+37 }
 0x2e8   : > { %v1089_v33 = vmul.f32 %v1629_v2, %v1088_v15 }
 0x2e9   : > { %v1631_v45 = vpop.eup %1630  ;;  %v1075_v48 = vadd.f32 %v1627_v54, %v1074_v27 }
 0x2ea   : > { %v1102_v51 = vmul.f32 %v1631_v45, %v1070_v34  ;;  %v1090_v58 = vadd.f32 %v1629_v2, %v1089_v33  ;;  %v1633_v20 = vpop.eup %1632  ;;  %vm1107_vm14 = vweird.f32 %v1631_v45 }
 0x2eb   : > { %v1079_v13 = vsel %vm1078_vm10, %v1627_v54, %v1075_v48  ;;  %vm1108_vm0 = vmor %vm1106_vm15, %vm1107_vm14 }
 0x2ec   : > { %v1103_v23 = vsub.f32 1.0, %v1102_v51  ;;  %v1084_v36 = vsel %vm1081_vm12, %v1083_v56, %v1079_v13  ;;  %v1094_v43 = vsel %vm1093_vm11, %v1629_v2, %v1090_v58 }
 0x2ed   : > { %v1099_v22 = vsel %vm1096_vm13, %v1098_v8, %v1094_v43  ;;  %v1118_v55 = vmul.f32 %v1633_v20, %v1084_v36 }
 0x2ee   : > { %v1104_v6 = vmul.f32 %v1631_v45, %v1103_v23  ;;  %v1117_v14 = vmul.f32 %v1099_v22, %v2084_v9 }
 0x2f0   : > { %v1119_v52 = vadd.f32 %v1118_v55, %v1117_v14  ;;  %v1105_v59 = vadd.f32 %v1631_v45, %v1104_v6 }
 0x2f2   : > { %1634 = vtanh.f32 %v1119_v52  ;;  %1123 = vst [vmem:[#allocation3] sm:$0xff] %v1119_v52  ;;  %v1109_v18 = vsel %vm1108_vm0, %v1631_v45, %v1105_v59 }
 0x2f3   : > { %v1114_v1 = vsel %vm1111_vm1, %v1113_v39, %v1109_v18 }
 0x2f7   : > { %1127 = sbr.rel (%p1452_p8) target bundleno = 930 (0x3a2), region = 60 }
 0x2f8   : > { %v1635_v40 = vpop.eup %1634 }
 0x2f9   : > { %v1121_v7 = vmul.f32 %v1635_v40, %v1114_v1 }
 0x2fb   : > { %1122 = vst [vmem:[#allocation2] sm:$0xff] %v1121_v7 }
 0x2fc   : > { %v1530_v9 = vld [vmem:[#allocation8 + $0x38] sm:$0xff]  ;;  %v1529_v47 = vld [vmem:[#allocation8 + $0x30] sm:$0xff]  ;;  %v1528_v60 = vld [vmem:[#allocation8 + $0x28] sm:$0xff] }
 0x2fd   : > { %1198 = vmatpush.bf16.msra.mxu0 %v1530_v9  ;;  %v1527_v35 = vld [vmem:[#allocation8 + $0x20] sm:$0xff]  ;;  %v1526_v4 = vld [vmem:[#allocation8 + $0x18] sm:$0xff]  ;;  %v1525_v63 = vld [vmem:[#allocation8 + $0x10] sm:$0xff] }
 0x2fe   : > { %v1524_v5 = vld [vmem:[#allocation8 + $0x8] sm:$0xff]  ;;  %v1523_v0 = vld [vmem:[#allocation8] sm:$0xff] }
 0x2ff   : > { %v1636_v19 = vld [vmem:[%s2108_s5] ss:$0 sm:$0xff] }
 0x301   : > { %1199 = vmatpush.bf16.msra.mxu0 %v1529_v47 }
 0x302   : > { %v1128_v31 = vld [vmem:[#allocation2] sm:$0xff] }
 0x303   : > { %v1129_v57 = vpack.c.bf16 %v1128_v31, %v1128_v31 }
 0x305   : > { %1200 = vmatpush.bf16.msra.mxu0 %v1528_v60 }
 0x309   : > { %1201 = vmatpush.bf16.msra.mxu0 %v1527_v35 }
 0x30d   : > { %1202 = vmatpush.bf16.msra.mxu0 %v1526_v4 }
 0x311   : > { %1203 = vmatpush.bf16.msra.mxu0 %v1525_v63 }
 0x315   : > { %1204 = vmatpush.bf16.msra.mxu0 %v1524_v5 }
 0x319   : > { %1205 = vmatpush.bf16.msra.mxu0 %v1523_v0 }
 0x31c   : > { %1206 = vmatmul.bf16.vlgmr.msra.gmra.mxu0 %v1129_v57 }
 0x399   : > { %v1207_v10 = vpop.f32.mrf.mxu0 }
 0x39a   : > { %v1208_v17 = vadd.f32 %v1636_v19, %v1207_v10 }
 0x39c   : > { %1211 = vst [vmem:[#allocation10] sm:$0xff] %v1208_v17 }
 0x3a1   : > { %v1209_v24 = vpop.f32.mrf.mxu0 }
 0x3a2 PF: > { %p1554_p9 = scmp.eq.s32.totalorder %s1797_s25, 1  ;;  %s1752_s27 = smov [#allocation10]  }
 0x3a3   : > { %s1218_s28 = sshll.u32 %s1752_s27, 4  ;;  %s1220_s7 = sshll.u32 %s2109_s6, 4  ;;  %s1219_s28 = int_to_ptr.vmem [resolvable:$true] %s1218_s28  ;;  %s1221_s7 = int_to_ptr.hbm [resolvable:$true] %s1220_s7 }
 0x3a4   : > { %1540 = dma.vmem_to_hbm [thread:$0]  (%p1554_p9), %s1219_s28, 128, %s1221_s7, [#allocation7]  }
 0x3a5   : > { %1738 = dma.done.wait (%p1554_p9), [#allocation7], 128  }
 0x3a6   : > { %1740 = vsyncadd (%p1554_p9), [#allocation7], 4294967168 }
 0x3a7 PF: > { %s19_s21 = sadd.s32 1, %s1743_s21  }
 0x3a8   : > { %p16_p10 = scmp.ge.s32.totalorder %s19_s21, 4  }
 0x3aa   :  { %18 = sbr.rel (!%p16_p10) target bundleno = 3 (0x3), region = 92 }
 0x3af   :  { %1234 = vsyncpa [#allocation6], 1 }
 0x3b0   :  { %1236 = vsyncpa [#allocation6 + $0x1], 1 }
 0x3b1   :  { %1237 = vsyncpa [#allocation9], 1 }
 0x3b2   :  { %1238 = vsyncpa [#allocation7], 1 }
 0x3b3   :  { %1240 = vsyncpa [#allocation7 + $0x1], 1 }

</bundles_post_ra>
